<compile_context>
chip_gen: v5e
topology: v5e:2x2
jax: 0.10.0
libtpu: 0.0.40
codegen_flags: <defaults>
</compile_context>

<pallas_src>
import functools

import jax
import jax.numpy as jnp
from jax.experimental import pallas as pl
from jax.experimental.pallas import tpu as pltpu

# cfg.* loss weights (deterministic, in-script)
LAMBDA_IMG = 1.0
LAMBDA_TRANS = 0.1
LAMBDA_EBD = 0.01
LAMBDA_KL = 0.001

_LANES = 128


def _rows128(x):
    """Flatten, zero-pad to a multiple of 128, reshape to a lane-dense (rows, 128) slab.

    Zero padding is exact for every reduction in this kernel:
      * sum-of-squares terms: 0^2 contributes 0
      * KL term: 1 + 0 - 0 - exp(0) = 0
    For contiguous inputs whose flattened size is already a multiple of 128 this
    is a free row-major reshape (no transpose kernel, no data movement).
    """
    flat = x.reshape(-1)
    pad = (-flat.shape[0]) % _LANES
    if pad:
        flat = jnp.pad(flat, (0, pad))
    return flat.reshape(-1, _LANES)


def _loss_kernel(pred_ref, gt_ref, msk_ref, slab_ref, out_ref, *, rows):
    """Fused loss reduction.

    pred/gt/msk: (R_img, 128) lane-dense slabs (mask already broadcast per-channel).
    slab:        (R_mu + R_lv + R_d + R_e, 128), rows = static row counts.
    out:         (5, 1) = [img, kl, trans, ebd, loss].
    """
    r_mu, r_lv, r_d, r_e = rows

    # ---- per-lane partials: reduce every axis except the lane axis ----------
    diff = pred_ref[...] - gt_ref[...]
    img_part = jnp.sum(diff * diff * msk_ref[...], axis=0, keepdims=True)   # (1,128)

    o = 0
    mu = slab_ref[o:o + r_mu, :]
    o += r_mu
    lv = slab_ref[o:o + r_lv, :]
    o += r_lv
    d = slab_ref[o:o + r_d, :]
    o += r_d
    e = slab_ref[o:o + r_e, :]

    kl_part = -0.5 * jnp.sum(1.0 + lv - mu * mu - jnp.exp(lv),
                             axis=0, keepdims=True)                          # (1,128)
    trans_part = jnp.sum(d * d, axis=0, keepdims=True)                       # (1,128)
    ebd_part = jnp.sum(e * e, axis=0, keepdims=True)                         # (1,128)

    # Weighted total as a fifth per-lane row (sum is linear, so this is exact)
    # — avoids any scalar extraction inside the kernel.
    loss_part = (LAMBDA_IMG * img_part + LAMBDA_EBD * ebd_part
                 + LAMBDA_KL * kl_part + LAMBDA_TRANS * trans_part)

    # ---- single cross-lane reduce produces all five scalars -----------------
    parts = jnp.concatenate(
        [img_part, kl_part, trans_part, ebd_part, loss_part], axis=0)        # (5,128)
    out_ref[...] = jnp.sum(parts, axis=-1, keepdims=True)                    # (5,1)


@jax.jit
def network_wrapper_losses(rgb_map, rgb, msk, mean, logvar, delta_nodes, embedding):
    """Single-invocation fused loss reduction.

    Wrapper does only layout plumbing (free reshapes + one mask broadcast + one
    concatenate), all fused under this jit; kernel emits one packed (5,1) output.
    """
    pred = _rows128(rgb_map.astype(jnp.float32))
    gt = _rows128(rgb.astype(jnp.float32))
    # Boolean-mask row selection `x[mask]` followed by a full sum == {0,1}
    # mask-weighted full sum; broadcast the mask per channel in the same
    # lane-dense layout as pred/gt.
    msk_b = _rows128(jnp.broadcast_to(msk.astype(jnp.float32)[:, :, None], rgb.shape))

    mu_s = _rows128(mean.astype(jnp.float32))
    lv_s = _rows128(logvar.astype(jnp.float32))
    d_s = _rows128(delta_nodes.astype(jnp.float32))
    e_s = _rows128(embedding.astype(jnp.float32))
    slab = jnp.concatenate([mu_s, lv_s, d_s, e_s], axis=0)
    rows = (mu_s.shape[0], lv_s.shape[0], d_s.shape[0], e_s.shape[0])

    vmem = pl.BlockSpec(memory_space=pltpu.MemorySpace.VMEM)
    cost = pl.CostEstimate(
        flops=int(5 * pred.size + 6 * slab.size + 5 * _LANES),
        transcendentals=int(lv_s.size),
        bytes_accessed=int(4 * (3 * pred.size + slab.size + 5)),
    )

    packed = pl.pallas_call(
        functools.partial(_loss_kernel, rows=rows),
        out_shape=jax.ShapeDtypeStruct((5, 1), jnp.float32),
        in_specs=[vmem, vmem, vmem, vmem],
        out_specs=vmem,
        cost_estimate=cost,
    )(pred, gt, msk_b, slab)

    # Split inside the jit so the caller gets five 0-d arrays from one dispatch.
    return (packed[0, 0], packed[1, 0], packed[2, 0], packed[3, 0], packed[4, 0])


def network_wrapper_forward(batch, ret):
    """Mirrors NetworkWrapper.forward given the renderer output `ret`."""
    img_loss, kl_loss, trans_loss, ebd_loss, loss = network_wrapper_losses(
        ret['rgb_map'], batch['rgb'], batch['msk'],
        ret['mean'], ret['logvar'], ret['delta_nodes'], ret['embedding'])
    scalar_stats = {
        'img_loss': img_loss,
        'kl_loss': kl_loss,
        'trans_loss': trans_loss,
        'ebd_loss': ebd_loss,
        'loss': loss,
    }
    image_stats = {}
    return ret, loss, scalar_stats, image_stats


def _reference(batch, ret):
    msk_f = batch['msk'].astype(jnp.float32)
    diff2 = (ret['rgb_map'] - batch['rgb']) ** 2
    img_loss = jnp.sum(jnp.sum(diff2, axis=-1) * msk_f)
    kl_loss = -0.5 * jnp.sum(1.0 + ret['logvar'] - ret['mean'] ** 2
                             - jnp.exp(ret['logvar']))
    trans_loss = jnp.sum(ret['delta_nodes'] ** 2)
    ebd_loss = jnp.sum(ret['embedding'] ** 2)
    loss = (LAMBDA_IMG * img_loss + LAMBDA_EBD * ebd_loss
            + LAMBDA_KL * kl_loss + LAMBDA_TRANS * trans_loss)
    return img_loss, kl_loss, trans_loss, ebd_loss, loss


if __name__ == "__main__":
    key = jax.random.PRNGKey(0)
    B, NR, NN, Z, E = 2, 128, 64, 128, 16   # batch, rays, nodes, latent, embed dim

    ks = jax.random.split(key, 7)
    # Deterministic stand-in for the renderer output + batch (see TODO above).
    ret = {
        'rgb_map':     jax.random.uniform(ks[0], (B, NR, 3), jnp.float32),
        'mean':        0.1 * jax.random.normal(ks[1], (B, Z), jnp.float32),
        'logvar':      0.1 * jax.random.normal(ks[2], (B, Z), jnp.float32),
        'delta_nodes': 0.01 * jax.random.normal(ks[3], (B, NN, 3), jnp.float32),
        'embedding':   0.1 * jax.random.normal(ks[4], (B, NN, E), jnp.float32),
    }
    batch = {
        'rgb': jax.random.uniform(ks[5], (B, NR, 3), jnp.float32),
        # Boolean mask, matching the boolean indexing `x[mask]` in the module.
        'msk': jax.random.uniform(ks[6], (B, NR)) > 0.3,
    }

    ret_out, loss, scalar_stats, image_stats = network_wrapper_forward(batch, ret)
    jax.block_until_ready(loss)

    # Correctness check against pure-JAX reference.
    ref_img, ref_kl, ref_trans, ref_ebd, ref_loss = _reference(batch, ret)
    assert jnp.allclose(scalar_stats['img_loss'], ref_img, rtol=1e-4, atol=1e-4)
    assert jnp.allclose(scalar_stats['kl_loss'], ref_kl, rtol=1e-4, atol=1e-4)
    assert jnp.allclose(scalar_stats['trans_loss'], ref_trans, rtol=1e-4, atol=1e-4)
    assert jnp.allclose(scalar_stats['ebd_loss'], ref_ebd, rtol=1e-4, atol=1e-4)
    assert jnp.allclose(loss, ref_loss, rtol=1e-4, atol=1e-4)

    print("KERNEL_OK")
</pallas_src>

<mosaic_0001>
module attributes {stable_mosaic.version = 11 : i64} {
  func.func @_loss_kernel(%arg0: memref<6x128xf32, #tpu.memory_space<vmem>>, %arg1: memref<6x128xf32, #tpu.memory_space<vmem>>, %arg2: memref<6x128xf32, #tpu.memory_space<vmem>>, %arg3: memref<23x128xf32, #tpu.memory_space<vmem>>, %arg4: memref<5x1xf32, #tpu.memory_space<vmem>>) attributes {dimension_semantics = [], scalar_prefetch = 0 : i64, scratch_operands = 0 : i64, tpu.core_type = #tpu.core_type<tc>} {
    %c0 = arith.constant 0 : index
    %c0_0 = arith.constant 0 : index
    %0 = vector.load %arg0[%c0, %c0_0] : memref<6x128xf32, #tpu.memory_space<vmem>>, vector<6x128xf32>
    %c0_1 = arith.constant 0 : index
    %c0_2 = arith.constant 0 : index
    %1 = vector.load %arg1[%c0_1, %c0_2] : memref<6x128xf32, #tpu.memory_space<vmem>>, vector<6x128xf32>
    %2 = arith.subf %0, %1 : vector<6x128xf32>
    %3 = arith.mulf %2, %2 : vector<6x128xf32>
    %c0_3 = arith.constant 0 : index
    %c0_4 = arith.constant 0 : index
    %4 = vector.load %arg2[%c0_3, %c0_4] : memref<6x128xf32, #tpu.memory_space<vmem>>, vector<6x128xf32>
    %5 = arith.mulf %3, %4 : vector<6x128xf32>
    %cst = arith.constant dense<0.000000e+00> : vector<128xf32>
    %6 = vector.multi_reduction <add>, %5, %cst [0] : vector<6x128xf32> to vector<128xf32>
    %7 = vector.shape_cast %6 : vector<128xf32> to vector<1x128xf32>
    %c0_5 = arith.constant 0 : index
    %c0_6 = arith.constant 0 : index
    %8 = vector.load %arg3[%c0_5, %c0_6] : memref<23x128xf32, #tpu.memory_space<vmem>>, vector<2x128xf32>
    %c2 = arith.constant 2 : index
    %c0_7 = arith.constant 0 : index
    %9 = vector.load %arg3[%c2, %c0_7] : memref<23x128xf32, #tpu.memory_space<vmem>>, vector<2x128xf32>
    %c4 = arith.constant 4 : index
    %c0_8 = arith.constant 0 : index
    %10 = vector.load %arg3[%c4, %c0_8] : memref<23x128xf32, #tpu.memory_space<vmem>>, vector<3x128xf32>
    %c7 = arith.constant 7 : index
    %c0_9 = arith.constant 0 : index
    %11 = vector.load %arg3[%c7, %c0_9] : memref<23x128xf32, #tpu.memory_space<vmem>>, vector<16x128xf32>
    %cst_10 = arith.constant 1.000000e+00 : f32
    %12 = vector.broadcast %cst_10 : f32 to vector<2x128xf32>
    %13 = arith.addf %12, %9 : vector<2x128xf32>
    %14 = arith.mulf %8, %8 : vector<2x128xf32>
    %15 = arith.subf %13, %14 : vector<2x128xf32>
    %16 = math.exp %9 : vector<2x128xf32>
    %17 = arith.subf %15, %16 : vector<2x128xf32>
    %cst_11 = arith.constant dense<0.000000e+00> : vector<128xf32>
    %18 = vector.multi_reduction <add>, %17, %cst_11 [0] : vector<2x128xf32> to vector<128xf32>
    %19 = vector.shape_cast %18 : vector<128xf32> to vector<1x128xf32>
    %cst_12 = arith.constant -5.000000e-01 : f32
    %20 = vector.broadcast %cst_12 : f32 to vector<1x128xf32>
    %21 = arith.mulf %20, %19 : vector<1x128xf32>
    %22 = arith.mulf %10, %10 : vector<3x128xf32>
    %cst_13 = arith.constant dense<0.000000e+00> : vector<128xf32>
    %23 = vector.multi_reduction <add>, %22, %cst_13 [0] : vector<3x128xf32> to vector<128xf32>
    %24 = vector.shape_cast %23 : vector<128xf32> to vector<1x128xf32>
    %25 = arith.mulf %11, %11 : vector<16x128xf32>
    %cst_14 = arith.constant dense<0.000000e+00> : vector<128xf32>
    %26 = vector.multi_reduction <add>, %25, %cst_14 [0] : vector<16x128xf32> to vector<128xf32>
    %27 = vector.shape_cast %26 : vector<128xf32> to vector<1x128xf32>
    %cst_15 = arith.constant 1.000000e+00 : f32
    %28 = vector.broadcast %cst_15 : f32 to vector<1x128xf32>
    %29 = arith.mulf %28, %7 : vector<1x128xf32>
    %cst_16 = arith.constant 0.00999999977 : f32
    %30 = vector.broadcast %cst_16 : f32 to vector<1x128xf32>
    %31 = arith.mulf %30, %27 : vector<1x128xf32>
    %32 = arith.addf %29, %31 : vector<1x128xf32>
    %cst_17 = arith.constant 1.000000e-03 : f32
    %33 = vector.broadcast %cst_17 : f32 to vector<1x128xf32>
    %34 = arith.mulf %33, %21 : vector<1x128xf32>
    %35 = arith.addf %32, %34 : vector<1x128xf32>
    %cst_18 = arith.constant 1.000000e-01 : f32
    %36 = vector.broadcast %cst_18 : f32 to vector<1x128xf32>
    %37 = arith.mulf %36, %24 : vector<1x128xf32>
    %38 = arith.addf %35, %37 : vector<1x128xf32>
    %39 = tpu.concatenate %7, %21, %24, %27, %38 in 0 : vector<1x128xf32>, vector<1x128xf32>, vector<1x128xf32>, vector<1x128xf32>, vector<1x128xf32> -> vector<5x128xf32>
    %cst_19 = arith.constant dense<0.000000e+00> : vector<5xf32>
    %40 = vector.multi_reduction <add>, %39, %cst_19 [1] : vector<5x128xf32> to vector<5xf32>
    %41 = vector.shape_cast %40 : vector<5xf32> to vector<5x1xf32>
    %c0_20 = arith.constant 0 : index
    %c0_21 = arith.constant 0 : index
    %42 = vector.load %arg4[%c0_20, %c0_21] : memref<5x1xf32, #tpu.memory_space<vmem>>, vector<5x1xf32>
    tpu.vector_store %arg4[%c0_20, %c0_21], %41 {strides = array<i32>} : memref<5x1xf32, #tpu.memory_space<vmem>>, vector<5x1xf32>,
    return
  }
}

</mosaic_0001>

<bundles_post_ra>
// kernel: network_wrapper_losses.1
= control target key start
LH: loop header
LB: loop body
LE: loop exit
PB: predicated region body
PF: predicated region fallthrough
CT: control target
= control target key end

     0   :  { %vm52_vm0 = vcmask 1042432   ;;  %vm23_vm1 = vcmask 1045504   ;;  %vm42_vm2 = vcmask 1041408   ;;  %vm75_vm3 = vcmask 1040384   ;;  %s149_s0 = inlined_call_operand.vmem [shape: f32[6,128], index: 0, kind: input, shape index: {}]   ;;  %s150_s1 = inlined_call_operand.vmem [shape: f32[6,128], index: 1, kind: input, shape index: {}]   ;;  %s151_s2 = inlined_call_operand.vmem [shape: f32[6,128], index: 2, kind: input, shape index: {}]   ;;  %s152_s3 = inlined_call_operand.vmem [shape: f32[23,128], index: 3, kind: input, shape index: {}]   ;;  %s153_s4 = inlined_call_operand.vmem [shape: f32[5,1], index: 4, kind: output, shape index: {}]  }
   0x1   :  { %v17_v0 = vld [vmem:[%s149_s0] sm:$0x3f]  ;;  %v34_v7 = vld [vmem:[%s152_s3 + $0x7] sm:$0xff]  ;;  %v35_v8 = vld [vmem:[%s152_s3 + $0xf] sm:$0xff]  ;;  %vm79_vm4 = vcmask 1043456   ;;  %vm81_vm5 = vcmask 1044480  }
   0x2   :  { %v18_v1 = vld [vmem:[%s150_s1] sm:$0x3f]  ;;  %v60_v14 = vmul.f32 %v34_v7, %v34_v7  ;;  %v61_v15 = vmul.f32 %v35_v8, %v35_v8  ;;  %vm85_vm6 = vcmask 4096  }
   0x3   :  { %v21_v2 = vld [vmem:[%s151_s2] sm:$0x3f]  ;;  %v19_v3 = vsub.f32 %v17_v0, %v18_v1 }
   0x4   :  { %v31_v4 = vld [vmem:[%s152_s3] sm:$0x3]  ;;  %v32_v5 = vld [vmem:[%s152_s3 + $0x2] sm:$0x3]  ;;  %v33_v6 = vld [vmem:[%s152_s3 + $0x4] sm:$0x7]  ;;  %v62_v19 = vadd.f32 %v61_v15, %v60_v14 }
   0x5   :  { %v36_v9 = vadd.f32 1.0, %v32_v5  ;;  %v39_v10 = vmul.f32 1.442695, %v32_v5  ;;  %v51_v11 = vmul.f32 %v33_v6, %v33_v6  ;;  %v20_v12 = vmul.f32 %v19_v3, %v19_v3 }
   0x6   :  { %v37_v13 = vmul.f32 %v31_v4, %v31_v4  ;;  %v63_v22 = vrot.slane %v62_v19, 4 }
   0x7   :  { %91 = vpow2.f32 %v39_v10  ;;  %v53_v16 = vsel %vm52_vm0, %v51_v11, 0.0  ;;  %v22_v17 = vmul.f32 %v21_v2, %v20_v12 }
   0x8   :  { %v54_v18 = vrot.slane %v53_v16, 4  ;;  %v38_v21 = vsub.f32 %v36_v9, %v37_v13  ;;  %v64_v25 = vadd.f32 %v63_v22, %v62_v19 }
   0x9   :  { %v24_v20 = vsel %vm23_vm1, %v22_v17, 0.0 }
   0xa   :  { %v25_v23 = vrot.slane %v24_v20, 4  ;;  %v55_v24 = vadd.f32 %v54_v18, %v53_v16  ;;  %v65_v29 = vrot.slane %v64_v25, 2 }
   0xc   :  { %v26_v27 = vadd.f32 %v25_v23, %v24_v20  ;;  %v56_v31 = vrot.slane %v55_v24, 2  ;;  %v66_v33 = vadd.f32 %v65_v29, %v64_v25 }
   0xd   :  { %v92_v26 = vpop.eup %91 }
   0xe   :  { %v41_v28 = vsub.f32 %v38_v21, %v92_v26  ;;  %v27_v30 = vrot.slane %v26_v27, 2  ;;  %v67_v36 = vrot.slane %v66_v33, 1  ;;  %v57_v38 = vadd.f32 %v56_v31, %v55_v24 }
  0x10   :  { %v43_v32 = vsel %vm42_vm2, %v41_v28, 0.0  ;;  %v28_v34 = vadd.f32 %v27_v30, %v26_v27  ;;  %v68_v41 = vadd.f32 %v67_v36, %v66_v33  ;;  %v58_v43 = vrot.slane %v57_v38, 1 }
  0x11   :  { %v44_v35 = vrot.slane %v43_v32, 4 }
  0x12   :  { %v29_v39 = vrot.slane %v28_v34, 1  ;;  %v69_v46 = vmul.f32 0.01, %v68_v41  ;;  %v59_v48 = vadd.f32 %v58_v43, %v57_v38 }
  0x13   :  { %v45_v37 = vadd.f32 %v44_v35, %v43_v32 }
  0x14   :  { %v30_v44 = vadd.f32 %v29_v39, %v28_v34  ;;  %v73_v52 = vmul.f32 0.1, %v59_v48 }
  0x15   :  { %v46_v40 = vrot.slane %v45_v37, 2 }
  0x16   :  { %v70_v50 = vadd.f32 %v69_v46, %v30_v44 }
  0x17   :  { %v47_v42 = vadd.f32 %v46_v40, %v45_v37 }
  0x19   :  { %v48_v45 = vrot.slane %v47_v42, 1 }
  0x1b   :  { %v49_v47 = vadd.f32 %v48_v45, %v47_v42 }
  0x1d   :  { %v50_v49 = vmul.f32 -0.5, %v49_v47 }
  0x1f   :  { %v71_v51 = vmul.f32 0.001, %v50_v49  ;;  %v76_v53 = vsel %vm75_vm3, %v30_v44, %v50_v49 }
  0x20   :  { %v77_v54 = vsel %vm42_vm2, %v76_v53, %v59_v48 }
  0x21   :  { %v72_v55 = vadd.f32 %v71_v51, %v70_v50  ;;  %v78_v56 = vsel %vm52_vm0, %v77_v54, %v68_v41 }
  0x23   :  { %v74_v57 = vadd.f32 %v73_v52, %v72_v55 }
  0x25   :  { %v80_v58 = vsel %vm79_vm4, %v78_v56, %v74_v57 }
  0x26   :  { %v82_v59 = vsel %vm81_vm5, %v80_v58, 0.0 }
  0x27   :  { %83 = vadd.xlane.f32.xlu0 %v82_v59 }
  0x9a   :  { %v84_v60 = vpop.xlane.xlu0 %83 }
  0x9b   :  { %86 = vst.msk [vmem:[%s153_s4] sm:$0x1f] %vm85_vm6, %v84_v60 }

</bundles_post_ra>
